<compile_context>
chip_gen: v7x
topology: tpu7x:2x2x1
jax: 0.10.0
libtpu: 0.0.40
codegen_flags: <defaults>
</compile_context>

<pallas_src>
import jax
import jax.numpy as jnp
from jax import lax
from jax.experimental import pallas as pl
from jax.experimental.pallas import tpu as pltpu


# ----------------------------------------------------------------------------
# Block sizing / compiler-param helpers
# ----------------------------------------------------------------------------

_TARGET_BLOCK_BYTES = 2 << 20          # ~2 MiB per-step slab (HBM sweet spot)
_DEFAULT_SCOPED_VMEM = 16 << 20        # conservative default (v5e)
_MAX_VMEM_LIMIT = 64 << 20             # v7x physical VMEM per TensorCore


def _choose_batch_block(B, per_batch_bytes):
    """Largest divisor of B giving ~_TARGET_BLOCK_BYTES per step, >= 2 steps."""
    bb = max(1, min(B, int(_TARGET_BLOCK_BYTES // max(per_batch_bytes, 1))))
    if bb >= B and B > 1:              # keep grid >= 2 steps (v7x megacore)
        bb = (B + 1) // 2
    while B % bb:                      # avoid ragged last block
        bb -= 1
    return bb


def _compiler_params(per_step_bytes):
    kwargs = dict(dimension_semantics=("parallel",))
    need = 2 * per_step_bytes + (1 << 20)   # double-buffered blocks + margin
    if need > _DEFAULT_SCOPED_VMEM:
        kwargs["vmem_limit_bytes"] = int(min(need, _MAX_VMEM_LIMIT))
    return pltpu.CompilerParams(**kwargs)


# ----------------------------------------------------------------------------
# Kernels (built per static config: eps / affine / subtract_last)
# ----------------------------------------------------------------------------

def _statistics(x, eps, subtract_last):
    """x: (Bb, T, C) f32. One reduction pass over T (shifted sum / sum-sq)."""
    t = x.shape[1]
    shift = x[:, 0:1, :]                                  # cancellation guard
    d = x - shift
    s1 = jnp.sum(d, axis=1, keepdims=True)                # (Bb, 1, C)
    s2 = jnp.sum(d * d, axis=1, keepdims=True)
    mean_d = s1 * (1.0 / t)
    var = jnp.maximum(s2 * (1.0 / t) - mean_d * mean_d, 0.0)   # unbiased=False
    std = jnp.sqrt(var + eps)                             # stored stat
    inv_std = lax.rsqrt(var + eps)                        # EUP rsqrt, no divide
    loc = x[:, t - 1:t, :] if subtract_last else shift + mean_d
    return loc, std, inv_std


def _make_norm_kernel(eps, affine, subtract_last):
    def kernel(x_ref, w_ref, b_ref, y_ref, loc_ref, std_ref):
        x = x_ref[...].astype(jnp.float32)                # (Bb, T, C)
        loc, std, inv_std = _statistics(x, eps, subtract_last)
        # Fold normalize + affine into one FMA per element:
        #   y = x * a + b,  a = w * inv_std,  b = bias - loc * a
        if affine:
            a = w_ref[...] * inv_std                      # (Bb, 1, C)
            b = b_ref[...] - loc * a
        else:
            a = inv_std
            b = -loc * a
        y_ref[...] = (x * a + b).astype(y_ref.dtype)
        loc_ref[...] = loc.astype(loc_ref.dtype)
        std_ref[...] = std.astype(std_ref.dtype)
    return kernel


def _make_stats_kernel(eps, subtract_last):
    # non_norm mode: statistics only; x is passed through unchanged outside.
    def kernel(x_ref, loc_ref, std_ref):
        x = x_ref[...].astype(jnp.float32)
        loc, std, _ = _statistics(x, eps, subtract_last)
        loc_ref[...] = loc.astype(loc_ref.dtype)
        std_ref[...] = std.astype(std_ref.dtype)
    return kernel


def _make_denorm_kernel(eps, affine):
    def kernel(x_ref, loc_ref, std_ref, w_ref, b_ref, y_ref):
        x = x_ref[...].astype(jnp.float32)                # (Bb, T, C)
        std = std_ref[...]
        loc = loc_ref[...]
        if affine:
            # per-feature reciprocal row, then one FMA per element
            inv_w = 1.0 / (w_ref[...] + eps * eps)        # (1, C) only
            scale = std * inv_w                           # (Bb, 1, C)
            shift = loc - b_ref[...] * scale
        else:
            scale = std
            shift = loc
        y_ref[...] = (x * scale + shift).astype(y_ref.dtype)
    return kernel


# ----------------------------------------------------------------------------
# Module wrapper (stateful, mirrors the PyTorch module)
# ----------------------------------------------------------------------------

class Normalize:
    def __init__(self, num_features, eps=1e-5, affine=False,
                 subtract_last=False, non_norm=False):
        self.num_features = num_features
        self.eps = float(eps)
        self.affine = affine
        self.subtract_last = subtract_last
        self.non_norm = non_norm
        # torch only creates these when affine=True; identity placeholders
        # otherwise (never read by the non-affine kernel branches).
        self.affine_weight = jnp.ones((num_features,), jnp.float32)
        self.affine_bias = jnp.zeros((num_features,), jnp.float32)
        # TODO(synk): stateful loc/stdev on the Python object mirrors the torch
        # buffers but is not jit/vmap safe.
        self.loc = None      # (B, 1, C): last value if subtract_last else mean
        self.stdev = None    # (B, 1, C)

    # ---- public API --------------------------------------------------------

    def __call__(self, x, mode):
        if mode == 'norm':
            y, loc, std = self._norm(x)
            self.loc, self.stdev = loc, std
            return y
        elif mode == 'denorm':
            return self._denorm(x)
        raise NotImplementedError(mode)

    # ---- pallas-backed forward paths ---------------------------------------

    def _norm(self, x):
        B, T, C = x.shape
        itemsize = jnp.dtype(x.dtype).itemsize
        stat_shapes = (jax.ShapeDtypeStruct((B, 1, C), jnp.float32),
                       jax.ShapeDtypeStruct((B, 1, C), jnp.float32))

        if self.non_norm:
            # Stats only; y is x itself -> no B*T*C HBM write at all.
            bb = _choose_batch_block(B, T * C * itemsize)
            per_step = bb * (T * C * itemsize + 8 * C)
            loc, std = pl.pallas_call(
                _make_stats_kernel(self.eps, self.subtract_last),
                out_shape=stat_shapes,
                grid=(B // bb,),
                in_specs=[pl.BlockSpec((bb, T, C), lambda i: (i, 0, 0))],
                out_specs=(pl.BlockSpec((bb, 1, C), lambda i: (i, 0, 0)),
                           pl.BlockSpec((bb, 1, C), lambda i: (i, 0, 0))),
                compiler_params=_compiler_params(per_step),
            )(x)
            return x, loc, std

        w = self.affine_weight.reshape(1, C)
        b = self.affine_bias.reshape(1, C)
        bb = _choose_batch_block(B, 2 * T * C * itemsize)
        per_step = bb * (2 * T * C * itemsize + 8 * C) + 8 * C
        y, loc, std = pl.pallas_call(
            _make_norm_kernel(self.eps, self.affine, self.subtract_last),
            out_shape=(jax.ShapeDtypeStruct((B, T, C), x.dtype),) + stat_shapes,
            grid=(B // bb,),
            in_specs=[
                pl.BlockSpec((bb, T, C), lambda i: (i, 0, 0)),   # x block
                pl.BlockSpec((1, C), lambda i: (0, 0)),          # weight
                pl.BlockSpec((1, C), lambda i: (0, 0)),          # bias
            ],
            out_specs=(
                pl.BlockSpec((bb, T, C), lambda i: (i, 0, 0)),   # y block
                pl.BlockSpec((bb, 1, C), lambda i: (i, 0, 0)),   # loc block
                pl.BlockSpec((bb, 1, C), lambda i: (i, 0, 0)),   # std block
            ),
            compiler_params=_compiler_params(per_step),
        )(x, w, b)
        return y, loc, std

    def _denorm(self, x):
        if self.non_norm:
            return x
        assert self.loc is not None and self.stdev is not None, \
            "call mode='norm' before mode='denorm'"
        B, T, C = x.shape
        itemsize = jnp.dtype(x.dtype).itemsize
        w = self.affine_weight.reshape(1, C)
        b = self.affine_bias.reshape(1, C)
        bb = _choose_batch_block(B, 2 * T * C * itemsize)
        per_step = bb * (2 * T * C * itemsize + 8 * C) + 8 * C
        return pl.pallas_call(
            _make_denorm_kernel(self.eps, self.affine),
            out_shape=jax.ShapeDtypeStruct((B, T, C), x.dtype),
            grid=(B // bb,),
            in_specs=[
                pl.BlockSpec((bb, T, C), lambda i: (i, 0, 0)),   # x block
                pl.BlockSpec((bb, 1, C), lambda i: (i, 0, 0)),   # loc block
                pl.BlockSpec((bb, 1, C), lambda i: (i, 0, 0)),   # std block
                pl.BlockSpec((1, C), lambda i: (0, 0)),          # weight
                pl.BlockSpec((1, C), lambda i: (0, 0)),          # bias
            ],
            out_specs=pl.BlockSpec((bb, T, C), lambda i: (i, 0, 0)),
            compiler_params=_compiler_params(per_step),
        )(x, self.loc, self.stdev, w, b)

    # ---- pure-JAX references (mirror the PyTorch forward) ------------------

    def _reference_norm(self, x):
        mean = jnp.mean(x, axis=1, keepdims=True)
        var = jnp.mean((x - mean) ** 2, axis=1, keepdims=True)
        std = jnp.sqrt(var + self.eps)
        loc = x[:, -1:, :] if self.subtract_last else mean
        if self.non_norm:
            return x, loc, std
        y = (x - loc) / std
        if self.affine:
            y = y * self.affine_weight + self.affine_bias
        return y, loc, std

    def _reference_denorm(self, x, loc, std):
        if self.non_norm:
            return x
        if self.affine:
            x = (x - self.affine_bias) / (self.affine_weight + self.eps * self.eps)
        return x * std + loc


# ----------------------------------------------------------------------------
# Self-test
# ----------------------------------------------------------------------------

if __name__ == "__main__":
    key = jax.random.PRNGKey(0)
    k_x, k_w, k_b = jax.random.split(key, 3)

    B, T, C = 2, 8, 32
    x = jax.random.normal(k_x, (B, T, C), jnp.float32) * 2.0 + 0.5

    # --- affine RevIN, mean-subtracted --------------------------------------
    layer = Normalize(C, eps=1e-5, affine=True)
    layer.affine_weight = jax.random.uniform(k_w, (C,), jnp.float32, 0.5, 1.5)
    layer.affine_bias = jax.random.normal(k_b, (C,), jnp.float32) * 0.1

    y = jax.block_until_ready(layer(x, 'norm'))
    y_ref, loc_ref, std_ref = layer._reference_norm(x)
    assert y.shape == (B, T, C)
    assert jnp.allclose(y, y_ref, atol=1e-5, rtol=1e-5), \
        float(jnp.max(jnp.abs(y - y_ref)))
    assert jnp.allclose(layer.loc, loc_ref, atol=1e-5, rtol=1e-5)
    assert jnp.allclose(layer.stdev, std_ref, atol=1e-5, rtol=1e-5)

    z = jax.block_until_ready(layer(y, 'denorm'))
    z_ref = layer._reference_denorm(y_ref, loc_ref, std_ref)
    assert jnp.allclose(z, z_ref, atol=1e-5, rtol=1e-5), \
        float(jnp.max(jnp.abs(z - z_ref)))
    assert jnp.allclose(z, x, atol=1e-4, rtol=1e-4)   # norm -> denorm round trip

    # --- subtract_last, no affine --------------------------------------------
    layer2 = Normalize(C, eps=1e-5, affine=False, subtract_last=True)
    y2 = jax.block_until_ready(layer2(x, 'norm'))
    y2_ref, loc2_ref, std2_ref = layer2._reference_norm(x)
    assert jnp.allclose(y2, y2_ref, atol=1e-5, rtol=1e-5)
    assert jnp.allclose(layer2.loc, loc2_ref, atol=1e-5, rtol=1e-5)
    assert jnp.allclose(layer2.stdev, std2_ref, atol=1e-5, rtol=1e-5)
    z2 = jax.block_until_ready(layer2(y2, 'denorm'))
    assert jnp.allclose(z2, x, atol=1e-4, rtol=1e-4)

    # --- non_norm pass-through (stats-only kernel) ---------------------------
    layer3 = Normalize(C, eps=1e-5, non_norm=True)
    y3 = jax.block_until_ready(layer3(x, 'norm'))
    _, loc3_ref, std3_ref = layer3._reference_norm(x)
    assert jnp.array_equal(y3, x)
    assert jnp.allclose(layer3.loc, loc3_ref, atol=1e-5, rtol=1e-5)
    assert jnp.allclose(layer3.stdev, std3_ref, atol=1e-5, rtol=1e-5)
    assert jnp.array_equal(layer3(y3, 'denorm'), y3)

    print("KERNEL_OK")
</pallas_src>

<mosaic_0001>
module attributes {stable_mosaic.version = 11 : i64} {
  func.func @kernel(%arg0: i32, %arg1: memref<1x8x32xf32, #tpu.memory_space<vmem>>, %arg2: memref<1x32xf32, #tpu.memory_space<vmem>>, %arg3: memref<1x32xf32, #tpu.memory_space<vmem>>, %arg4: memref<1x8x32xf32, #tpu.memory_space<vmem>>, %arg5: memref<1x1x32xf32, #tpu.memory_space<vmem>>, %arg6: memref<1x1x32xf32, #tpu.memory_space<vmem>>) attributes {dimension_semantics = [#tpu.dimension_semantics<parallel>], iteration_bounds = array<i64: 2>, scalar_prefetch = 0 : i64, scratch_operands = 0 : i64, tpu.core_type = #tpu.core_type<tc>, window_params = [{transform_indices = @transform_0, window_bounds = array<i64: 1, 8, 32>}, {pipeline_mode = #tpu.pipeline_mode<synchronous>, transform_indices = @transform_1, window_bounds = array<i64: 1, 32>}, {pipeline_mode = #tpu.pipeline_mode<synchronous>, transform_indices = @transform_2, window_bounds = array<i64: 1, 32>}, {transform_indices = @transform_3, window_bounds = array<i64: 1, 8, 32>}, {transform_indices = @transform_4, window_bounds = array<i64: 1, 1, 32>}, {transform_indices = @transform_5, window_bounds = array<i64: 1, 1, 32>}]} {
    %c0 = arith.constant 0 : index
    %c0_0 = arith.constant 0 : index
    %c0_1 = arith.constant 0 : index
    %0 = vector.load %arg1[%c0, %c0_0, %c0_1] : memref<1x8x32xf32, #tpu.memory_space<vmem>>, vector<1x8x32xf32>
    %1 = vector.extract_strided_slice %0 {offsets = [0, 0, 0], sizes = [1, 1, 32], strides = [1, 1, 1]} : vector<1x8x32xf32> to vector<1x1x32xf32>
    %2 = vector.broadcast %1 : vector<1x1x32xf32> to vector<1x8x32xf32>
    %3 = arith.subf %0, %2 : vector<1x8x32xf32>
    %cst = arith.constant dense<0.000000e+00> : vector<1x32xf32>
    %4 = vector.multi_reduction <add>, %3, %cst [1] : vector<1x8x32xf32> to vector<1x32xf32>
    %5 = vector.shape_cast %4 : vector<1x32xf32> to vector<1x1x32xf32>
    %6 = arith.mulf %3, %3 : vector<1x8x32xf32>
    %cst_2 = arith.constant dense<0.000000e+00> : vector<1x32xf32>
    %7 = vector.multi_reduction <add>, %6, %cst_2 [1] : vector<1x8x32xf32> to vector<1x32xf32>
    %8 = vector.shape_cast %7 : vector<1x32xf32> to vector<1x1x32xf32>
    %cst_3 = arith.constant 1.250000e-01 : f32
    %9 = vector.broadcast %cst_3 : f32 to vector<1x1x32xf32>
    %10 = arith.mulf %5, %9 : vector<1x1x32xf32>
    %cst_4 = arith.constant 1.250000e-01 : f32
    %11 = vector.broadcast %cst_4 : f32 to vector<1x1x32xf32>
    %12 = arith.mulf %8, %11 : vector<1x1x32xf32>
    %13 = arith.mulf %10, %10 : vector<1x1x32xf32>
    %14 = arith.subf %12, %13 : vector<1x1x32xf32>
    %cst_5 = arith.constant 0.000000e+00 : f32
    %15 = vector.broadcast %cst_5 : f32 to vector<1x1x32xf32>
    %16 = arith.maximumf %14, %15 : vector<1x1x32xf32>
    %cst_6 = arith.constant 9.99999974E-6 : f32
    %17 = vector.broadcast %cst_6 : f32 to vector<1x1x32xf32>
    %18 = arith.addf %16, %17 : vector<1x1x32xf32>
    %19 = math.sqrt %18 : vector<1x1x32xf32>
    %cst_7 = arith.constant 9.99999974E-6 : f32
    %20 = vector.broadcast %cst_7 : f32 to vector<1x1x32xf32>
    %21 = arith.addf %16, %20 : vector<1x1x32xf32>
    %22 = math.rsqrt %21 : vector<1x1x32xf32>
    %23 = arith.addf %1, %10 : vector<1x1x32xf32>
    %c0_8 = arith.constant 0 : index
    %c0_9 = arith.constant 0 : index
    %24 = vector.load %arg2[%c0_8, %c0_9] : memref<1x32xf32, #tpu.memory_space<vmem>>, vector<1x32xf32>
    %25 = vector.shape_cast %24 : vector<1x32xf32> to vector<1x1x32xf32>
    %26 = arith.mulf %25, %22 : vector<1x1x32xf32>
    %c0_10 = arith.constant 0 : index
    %c0_11 = arith.constant 0 : index
    %27 = vector.load %arg3[%c0_10, %c0_11] : memref<1x32xf32, #tpu.memory_space<vmem>>, vector<1x32xf32>
    %28 = arith.mulf %23, %26 : vector<1x1x32xf32>
    %29 = vector.shape_cast %27 : vector<1x32xf32> to vector<1x1x32xf32>
    %30 = arith.subf %29, %28 : vector<1x1x32xf32>
    %31 = vector.broadcast %26 : vector<1x1x32xf32> to vector<1x8x32xf32>
    %32 = arith.mulf %0, %31 : vector<1x8x32xf32>
    %33 = vector.broadcast %30 : vector<1x1x32xf32> to vector<1x8x32xf32>
    %34 = arith.addf %32, %33 : vector<1x8x32xf32>
    %c0_12 = arith.constant 0 : index
    %c0_13 = arith.constant 0 : index
    %c0_14 = arith.constant 0 : index
    %35 = vector.load %arg4[%c0_12, %c0_13, %c0_14] : memref<1x8x32xf32, #tpu.memory_space<vmem>>, vector<1x8x32xf32>
    tpu.vector_store %arg4[%c0_12, %c0_13, %c0_14], %34 {strides = array<i32>} : memref<1x8x32xf32, #tpu.memory_space<vmem>>, vector<1x8x32xf32>,
    %c0_15 = arith.constant 0 : index
    %c0_16 = arith.constant 0 : index
    %c0_17 = arith.constant 0 : index
    %36 = vector.load %arg5[%c0_15, %c0_16, %c0_17] : memref<1x1x32xf32, #tpu.memory_space<vmem>>, vector<1x1x32xf32>
    tpu.vector_store %arg5[%c0_15, %c0_16, %c0_17], %23 {strides = array<i32>} : memref<1x1x32xf32, #tpu.memory_space<vmem>>, vector<1x1x32xf32>,
    %c0_18 = arith.constant 0 : index
    %c0_19 = arith.constant 0 : index
    %c0_20 = arith.constant 0 : index
    %37 = vector.load %arg6[%c0_18, %c0_19, %c0_20] : memref<1x1x32xf32, #tpu.memory_space<vmem>>, vector<1x1x32xf32>
    tpu.vector_store %arg6[%c0_18, %c0_19, %c0_20], %19 {strides = array<i32>} : memref<1x1x32xf32, #tpu.memory_space<vmem>>, vector<1x1x32xf32>,
    return
  }
  func.func @transform_0(%arg0: i32) -> (i32, i32, i32) {
    %c0_i32 = arith.constant 0 : i32
    %c0_i32_0 = arith.constant 0 : i32
    %c0_i32_1 = arith.constant 0 : i32
    return %arg0, %c0_i32, %c0_i32_0 : i32, i32, i32
  }
  func.func @transform_1(%arg0: i32) -> (i32, i32) {
    %c0_i32 = arith.constant 0 : i32
    %c0_i32_0 = arith.constant 0 : i32
    %c0_i32_1 = arith.constant 0 : i32
    return %c0_i32, %c0_i32_0 : i32, i32
  }
  func.func @transform_2(%arg0: i32) -> (i32, i32) {
    %c0_i32 = arith.constant 0 : i32
    %c0_i32_0 = arith.constant 0 : i32
    %c0_i32_1 = arith.constant 0 : i32
    return %c0_i32, %c0_i32_0 : i32, i32
  }
  func.func @transform_3(%arg0: i32) -> (i32, i32, i32) {
    %c0_i32 = arith.constant 0 : i32
    %c0_i32_0 = arith.constant 0 : i32
    %c0_i32_1 = arith.constant 0 : i32
    return %arg0, %c0_i32, %c0_i32_0 : i32, i32, i32
  }
  func.func @transform_4(%arg0: i32) -> (i32, i32, i32) {
    %c0_i32 = arith.constant 0 : i32
    %c0_i32_0 = arith.constant 0 : i32
    %c0_i32_1 = arith.constant 0 : i32
    return %arg0, %c0_i32, %c0_i32_0 : i32, i32, i32
  }
  func.func @transform_5(%arg0: i32) -> (i32, i32, i32) {
    %c0_i32 = arith.constant 0 : i32
    %c0_i32_0 = arith.constant 0 : i32
    %c0_i32_1 = arith.constant 0 : i32
    return %arg0, %c0_i32, %c0_i32_0 : i32, i32, i32
  }
}

</mosaic_0001>

<bundles_post_ra>
// kernel: tpu_custom_call.1
= control target key start
LH: loop header
LB: loop body
LE: loop exit
PB: predicated region body
PF: predicated region fallthrough
CT: control target
= control target key end

     0   :  { %11 = vsyncpa [#allocation3], 0  ;;  %s1018_s0 = inlined_call_operand.hbm [shape: f32[2,8,32], index: 0, kind: input, shape index: {}]   ;;  %s1019_s1 = inlined_call_operand.vmem [shape: f32[1,32], index: 1, kind: input, shape index: {}]   ;;  %s1020_s2 = inlined_call_operand.vmem [shape: f32[1,32], index: 2, kind: input, shape index: {}]   ;;  %s1021_s3 = inlined_call_operand.hbm [shape: f32[2,8,32], index: 3, kind: output, shape index: {0}]   ;;  %s1022_s4 = inlined_call_operand.hbm [shape: f32[2,1,32], index: 4, kind: output, shape index: {1}]   ;;  %s1023_s5 = inlined_call_operand.hbm [shape: f32[2,1,32], index: 5, kind: output, shape index: {2}]  }
   0x1   :  { %13 = vsyncpa [#allocation3 + $0x1], 0 }
   0x2   :  { %14 = vsyncpa [#allocation4], 0 }
   0x3   :  { %16 = vsyncpa [#allocation4 + $0x1], 0 }
   0x4   :  { %17 = vsyncpa [#allocation7], 0 }
   0x5   :  { %19 = vsyncpa [#allocation7 + $0x1], 0  ;;  %s751_s18 = smov 0   ;;  %s753_s19 = smov 0  }
   0x6   :  { %s755_s20 = smov 0   ;;  %s757_s21 = smov 0  }
   0x7 LB: > { %s772_s22 = sadd.s32 4294967295, %s715_s21   ;;  %s487_s23 = sadd.s32 4294967294, %s715_s21   ;;  %s715_s21 = sphi %s757_s21, %s1038_s21   ;;  %s711_s20 = sphi %s755_s20, %s1037_s20   ;;  %s707_s19 = sphi %s753_s19, %s1036_s19   ;;  %s703_s18 = sphi %s751_s18, %s1035_s18  }
   0x8   : > { %s776_s24 = sadd.s32 1, %s715_s21   ;;  %s32_s25 = sadd.s32 1, %s711_s20 }
   0x9   : > { %s29_s26 = ssub.s32 %s715_s21, %s776_s24  ;;  %p39_p0 = scmp.ne.s32.totalorder %s711_s20, %s707_s19 }
   0xa   : > { %p30_p1 = scmp.eq.s32.totalorder %s29_s26, 0  ;;  %p40_p2 = scmp.eq.s32.totalorder %s715_s21, 0 }
   0xb   : > { %p45_p3 = scmp.ne.s32.totalorder %s707_s19, %s703_s18  ;;  %p46_p4 = scmp.eq.s32.totalorder %s772_s22, 0 }
   0xc   : > { %s788_s27 = scalar_select %p30_p1, %s711_s20, %s32_s25  }
   0xd   : > { %p790_p5 = por %p40_p2, %p39_p0  ;;  %p794_p6 = por %p46_p4, %p45_p3 }
   0xe   : > { %p111_p7 = scmp.eq.s32.totalorder %s772_s22, 1  ;;  %p117_p8 = scmp.eq.s32.totalorder %s487_s23, 1 }
   0xf   : > { %p523_p10 = scmp.lt.s32.totalorder %s715_s21, 2  ;;  %s195_s7 = sand.u32 1, %s711_s20  }
  0x10   : > { %p803_p11 = por %p111_p7, %p39_p0  ;;  %p807_p12 = por %p117_p8, %p45_p3 }
  0x11   : > { %s491_s8 = sshll.u32 %s715_s21, 7  ;;  %s490_s9 = sshll.u32 %s195_s7, 3 }
  0x12   : > { %s1027_s30 = scalar_select %p803_p11, 1, 0 }
  0x13   : > { %s1028_s6 = scalar_select %p807_p12, 1, 0 }
  0x14   : > { %s816_s12 = scalar_lea.hbm %s1018_s0, %s491_s8  ;;  %s199_s13 = scalar_lea.vmem [#allocation2], %s490_s9 }
  0x15   : > { %s206_s14 = sshll.u32 %s199_s13, 4  ;;  %p820_p13 = pnand %p523_p10, %p790_p5  ;;  %s824_s14 = int_to_ptr.vmem [resolvable:$true] %s206_s14 }
  0x16   : > { %s196_s16 = scalar_lea.sflag [#allocation3], %s195_s7  ;;  %s559_s17 = scalar_lea.hbm %s816_s12, 128 }
  0x17   : > { %p560_p2 = scmp.ne.s32.totalorder %s816_s12, %s559_s17  ;;  %p561_p3 = pneg %p820_p13 }
  0x18   : > { %s564_s28 = scalar_lea.hbm %s1018_s0, 256  ;;  %p565_p5 = scmp.lt.u32.totalorder %s816_s12, %s1018_s0 }
  0x19   : > { %p562_p4 = pnand %p561_p3, %p560_p2  ;;  %p566_p8 = scmp.lt.u32.totalorder %s564_s28, %s559_s17 }
  0x1a   : > { %p568_p9 = scmp.lt.u32.totalorder %s559_s17, %s816_s12 }
  0x1b   : > { %p563_p7 = pneg %p562_p4  ;;  %p567_p10 = por %p566_p8, %p565_p5 }
  0x1d   : > { %p569_p0 = por %p568_p9, %p567_p10 }
  0x1f   : > { %p570_p1 = pnand %p569_p0, %p563_p7 }
  0x21   : > { %573 = shalt.err (!%p570_p1)
}
  0x22   : > { %s574_s7 = scalar_lea.vmem %s824_s14, 128  ;;  %s717_s10 = smov [#allocation2]  }
  0x23   : > { %p575_p2 = scmp.ne.s32.totalorder %s824_s14, %s574_s7  ;;  %s579_s11 = sshll.u32 %s717_s10, 4  ;;  %s580_s11 = int_to_ptr.vmem [resolvable:$false] %s579_s11 }
  0x24   : > { %s581_s13 = scalar_lea.vmem %s580_s11, 256  ;;  %p582_p11 = scmp.lt.s32.totalorder %s824_s14, %s580_s11 }
  0x25   : > { %p577_p4 = pnand %p575_p2, %p561_p3  ;;  %p583_p5 = scmp.lt.s32.totalorder %s581_s13, %s574_s7 }
  0x27   : > { %p578_p12 = pneg %p577_p4  ;;  %p584_p8 = por %p583_p5, %p582_p11 }
  0x29   : > { %p585_p9 = pnand %p584_p8, %p578_p12 }
  0x2b   : > { %588 = shalt.err (!%p585_p9)
}
  0x2c   : > { %512 = dma.hbm_to_vmem [thread:$0]  (!%p820_p13), %s816_s12, 128, %s824_s14, %s196_s16  }
  0x2d   : > { %p1030_p0 = scmp.lt.s32.totalorder %s715_s21, 3  ;;  %p1031_p1 = scmp.ge.s32.totalorder %s715_s21, 1 }
  0x2f   : > { %p212_p3 = pnand %p1031_p1, %p1030_p0 }
  0x30   : > { %s858_s17 = sand.u32 (!%p212_p3), 1, %s707_s19  }
  0x31   : > { %215 = sbr.rel (%p212_p3) target bundleno = 153 (0x99), region = 32  ;;  %s493_s25 = sshll.u32 (!%p212_p3), %s858_s17, 3 }
  0x32   : > { %s218_s26 = scalar_lea.sflag (!%p212_p3), [#allocation3], %s858_s17  ;;  %s221_s15 = scalar_lea.vmem (!%p212_p3), [#allocation2], %s493_s25 }
  0x38   : > { %690 = dma.done.wait (%p794_p6), %s218_s26, 128  }
  0x39   : > { %692 = vsyncadd (%p794_p6), %s218_s26, 4294967168  ;;  %v257_v0 = vlaneseq  ;;  %v870_v3 = vld [vmem:[%s221_s15] sm:$0xff]  ;;  %vm262_vm0 = vcmask 261120   ;;  %s249_s29 = scalar_lea.vmem [#allocation6], %s858_s17  ;;  %s321_s14 = sand.u32 1, %s772_s22   ;;  %vm313_vm1 = vcmask 253952  }
  0x3a   : > { %s351_s12 = sshll.u32 %s249_s29, 4  ;;  %s497_s16 = sshll.u32 %s772_s22, 4  ;;  %s880_s12 = int_to_ptr.vmem [resolvable:$true] %s351_s12 }
  0x3b   : > { %v258_v1 = vshrl.u32 %v257_v0, 7  ;;  %s888_s9 = scalar_lea.hbm %s1022_s4, %s497_s16  ;;  %s891_s7 = scalar_lea.sflag [#allocation7], %s321_s14 }
  0x3c   : > { %s589_s10 = scalar_lea.vmem %s880_s12, 16  ;;  %p1032_p11 = scmp.ne.s32.totalorder %s1027_s30, 0 }
  0x3d   : > { %v868_v2 = vsub.s32 0, %v258_v1  ;;  %p590_p6 = scmp.ne.s32.totalorder %s880_s12, %s589_s10  ;;  %s718_s11 = smov [#allocation6]  }
  0x3e   : > { %s593_s13 = sshll.u32 %s718_s11, 4  ;;  %s594_s13 = int_to_ptr.vmem [resolvable:$false] %s593_s13 }
  0x3f   : > { %v260_v4 = vrot.slane %v870_v3, %v868_v2  ;;  %p591_p12 = pnand %p590_p6, %p1032_p11  ;;  %s595_s26 = scalar_lea.vmem %s594_s13, 32 }
  0x40   : > { %p596_p7 = scmp.lt.s32.totalorder %s880_s12, %s594_s13  ;;  %p597_p10 = scmp.lt.s32.totalorder %s595_s26, %s589_s10 }
  0x41   : > { %v261_v5 = vsub.f32 %v870_v3, %v260_v4  ;;  %p592_p13 = pneg %p591_p12 }
  0x42   : > { %p598_p2 = por %p597_p10, %p596_p7 }
  0x43   : > { %v263_v6 = vsel %vm262_vm0, %v261_v5, 0.0  ;;  %v270_v7 = vmul.f32 %v261_v5, %v261_v5 }
  0x44   : > { %v264_v8 = vrot.slane %v263_v6, 4  ;;  %p599_p4 = pnand %p598_p2, %p592_p13 }
  0x45   : > { %v271_v9 = vsel %vm262_vm0, %v270_v7, 0.0 }
  0x46   : > { %v265_v10 = vadd.f32 %v264_v8, %v263_v6  ;;  %v272_v11 = vrot.slane %v271_v9, 4 }
  0x48   : > { %v266_v12 = vrot.slane %v265_v10, 2  ;;  %v273_v13 = vadd.f32 %v272_v11, %v271_v9 }
  0x4a   : > { %v267_v14 = vadd.f32 %v266_v12, %v265_v10  ;;  %v274_v15 = vrot.slane %v273_v13, 2 }
  0x4c   : > { %v268_v16 = vrot.slane %v267_v14, 1  ;;  %v275_v17 = vadd.f32 %v274_v15, %v273_v13 }
  0x4e   : > { %v269_v18 = vadd.f32 %v268_v16, %v267_v14  ;;  %v276_v19 = vrot.slane %v275_v17, 1 }
  0x50   : > { %v277_v20 = vadd.f32 %v276_v19, %v275_v17  ;;  %v278_v21 = vmul.f32 0.125, %v269_v18 }
  0x52   : > { %v279_v22 = vmul.f32 0.125, %v277_v20  ;;  %v280_v23 = vmul.f32 %v278_v21, %v278_v21  ;;  %v292_v24 = vadd.f32 %v278_v21, %v870_v3 }
  0x54   : > { %v281_v25 = vsub.f32 %v279_v22, %v280_v23  ;;  %314 = vst.msk [vmem:[%s249_s29] sm:$0x1] %vm313_vm1, %v292_v24 }
  0x55   : > { %602 = shalt.err (!%p599_p4)
}
  0x56   : > { %s603_s15 = scalar_lea.hbm %s888_s9, 16  ;;  %s607_s28 = scalar_lea.hbm %s1022_s4, 32 }
  0x57   : > { %p604_p5 = scmp.ne.s32.totalorder %s888_s9, %s603_s15  ;;  %p608_p0 = scmp.lt.u32.totalorder %s888_s9, %s1022_s4 }
  0x58   : > { %p609_p1 = scmp.lt.u32.totalorder %s607_s28, %s603_s15  ;;  %p611_p6 = scmp.lt.u32.totalorder %s603_s15, %s888_s9 }
  0x59   : > { %p605_p8 = pnand %p604_p5, %p1032_p11 }
  0x5a   : > { %p610_p3 = por %p609_p1, %p608_p0 }
  0x5b   : > { %p606_p9 = pneg %p605_p8 }
  0x5c   : > { %p612_p12 = por %p611_p6, %p610_p3 }
  0x5e   : > { %p613_p13 = pnand %p612_p12, %p606_p9 }
  0x60   : > { %616 = shalt.err (!%p613_p13)
}
  0x61   : > { %504 = dma.vmem_to_hbm [thread:$0]  (%p1032_p11), %s880_s12, 16, %s888_s9, %s891_s7   ;;  %v282_v26 = vmax.f32 %v281_v25, 0.0  ;;  %v293_v28 = vld [vmem:[%s1019_s1] sm:$0x1] }
  0x62   : > { %s255_s26 = scalar_lea.vmem [#allocation8], %s858_s17  ;;  %v295_v33 = vld [vmem:[%s1020_s2] sm:$0x1]  ;;  %s930_s28 = scalar_lea.hbm %s1023_s5, %s497_s16 }
  0x63   : > { %v283_v27 = vadd.f32 1e-05, %v282_v26  ;;  %s364_s15 = sshll.u32 %s255_s26, 4  ;;  %s935_s8 = scalar_lea.vmem [#allocation5], %s493_s25  ;;  %s923_s15 = int_to_ptr.vmem [resolvable:$true] %s364_s15 }
  0x64   : > { %s338_s11 = sshll.u32 %s935_s8, 4  ;;  %s496_s10 = sshll.u32 %s772_s22, 7  ;;  %s965_s11 = int_to_ptr.vmem [resolvable:$true] %s338_s11 }
  0x65   : > { %557 = vrsqrt.f32 %v283_v27  ;;  %vm286_vm2 = vcmp.eq.f32.partialorder %v283_v27, inf  ;;  %v289_v30 = vand.u32 2147483648, %v283_v27  ;;  %vm288_vm3 = vcmp.eq.f32.partialorder %v283_v27, 0.0  ;;  %s617_s13 = scalar_lea.vmem %s923_s15, 16  ;;  %s719_s16 = smov [#allocation8]  }
  0x66   : > { %p618_p7 = scmp.ne.s32.totalorder %s923_s15, %s617_s13  ;;  %s621_s29 = sshll.u32 %s719_s16, 4  ;;  %s622_s29 = int_to_ptr.vmem [resolvable:$false] %s621_s29 }
  0x67   : > { %s623_s12 = scalar_lea.vmem %s622_s29, 32  ;;  %p624_p4 = scmp.lt.s32.totalorder %s923_s15, %s622_s29 }
  0x68   : > { %p619_p10 = pnand %p618_p7, %p1032_p11  ;;  %p625_p5 = scmp.lt.s32.totalorder %s623_s12, %s617_s13 }
  0x6a   : > { %p620_p2 = pneg %p619_p10  ;;  %p626_p8 = por %p625_p5, %p624_p4 }
  0x6c   : > { %p627_p9 = pnand %p626_p8, %p620_p2 }
  0x6f   : > { %v558_v29 = vpop.eup %557 }
  0x70   : > { %v294_v31 = vmul.f32 %v558_v29, %v293_v28  ;;  %v285_v32 = vmul.f32 %v558_v29, %v283_v27 }
  0x72   : > { %v296_v34 = vmul.f32 %v294_v31, %v292_v24  ;;  %v302_v35 = vrot.slane %v294_v31, %v868_v2  ;;  %v287_v36 = vsel %vm286_vm2, %v283_v27, %v285_v32 }
  0x73   : > { %v290_v37 = vsel %vm288_vm3, %v289_v30, %v287_v36 }
  0x74   : > { %v297_v38 = vsub.f32 %v295_v33, %v296_v34  ;;  %v304_v39 = vmul.f32 %v302_v35, %v870_v3  ;;  %315 = vst.msk [vmem:[%s255_s26] sm:$0x1] %vm313_vm1, %v290_v37 }
  0x75   : > { %630 = shalt.err (!%p627_p9)
}
  0x76   : > { %s631_s25 = scalar_lea.hbm %s930_s28, 16  ;;  %s635_s14 = scalar_lea.hbm %s1023_s5, 32 }
  0x77   : > { %p632_p0 = scmp.ne.s32.totalorder %s930_s28, %s631_s25  ;;  %p636_p6 = scmp.lt.u32.totalorder %s930_s28, %s1023_s5 }
  0x78   : > { %p637_p12 = scmp.lt.u32.totalorder %s635_s14, %s631_s25  ;;  %p639_p7 = scmp.lt.u32.totalorder %s631_s25, %s930_s28 }
  0x79   : > { %p633_p1 = pnand %p632_p0, %p1032_p11 }
  0x7a   : > { %p638_p13 = por %p637_p12, %p636_p6 }
  0x7b   : > { %p634_p3 = pneg %p633_p1 }
  0x7c   : > { %p640_p10 = por %p639_p7, %p638_p13 }
  0x7e   : > { %p641_p2 = pnand %p640_p10, %p634_p3 }
  0x80   : > { %644 = shalt.err (!%p641_p2)
}
  0x81   : > { %505 = dma.vmem_to_hbm [thread:$0]  (%p1032_p11), %s923_s15, 16, %s930_s28, %s891_s7   ;;  %v309_v40 = vrot.slane %v297_v38, %v868_v2 }
  0x82   : > { %s972_s25 = scalar_lea.hbm %s1021_s3, %s496_s10  ;;  %s317_s26 = scalar_lea.sflag [#allocation4], %s858_s17 }
  0x83   : > { %v311_v41 = vadd.f32 %v309_v40, %v304_v39  ;;  %s645_s9 = scalar_lea.vmem %s965_s11, 128  ;;  %s720_s7 = smov [#allocation5]  }
  0x84   : > { %p646_p4 = scmp.ne.s32.totalorder %s965_s11, %s645_s9  ;;  %s649_s15 = sshll.u32 %s720_s7, 4  ;;  %s650_s15 = int_to_ptr.vmem [resolvable:$false] %s649_s15 }
  0x85   : > { %312 = vst.msk [vmem:[%s935_s8] sm:$0xff] %vm262_vm0, %v311_v41  ;;  %s651_s28 = scalar_lea.vmem %s650_s15, 256  ;;  %p652_p9 = scmp.lt.s32.totalorder %s965_s11, %s650_s15 }
  0x86   : > { %p647_p5 = pnand %p646_p4, %p1032_p11  ;;  %p653_p0 = scmp.lt.s32.totalorder %s651_s28, %s645_s9 }
  0x88   : > { %p648_p8 = pneg %p647_p5  ;;  %p654_p1 = por %p653_p0, %p652_p9 }
  0x8a   : > { %p655_p3 = pnand %p654_p1, %p648_p8 }
  0x8c   : > { %658 = shalt.err (!%p655_p3)
}
  0x8d   : > { %s659_s22 = scalar_lea.hbm %s972_s25, 128  ;;  %s663_s10 = scalar_lea.hbm %s1021_s3, 256 }
  0x8e   : > { %p660_p6 = scmp.ne.s32.totalorder %s972_s25, %s659_s22  ;;  %p664_p7 = scmp.lt.u32.totalorder %s972_s25, %s1021_s3 }
  0x8f   : > { %p665_p10 = scmp.lt.u32.totalorder %s663_s10, %s659_s22  ;;  %p667_p4 = scmp.lt.u32.totalorder %s659_s22, %s972_s25 }
  0x90   : > { %p661_p12 = pnand %p660_p6, %p1032_p11 }
  0x91   : > { %p666_p2 = por %p665_p10, %p664_p7 }
  0x92   : > { %p662_p13 = pneg %p661_p12 }
  0x93   : > { %p668_p5 = por %p667_p4, %p666_p2 }
  0x95   : > { %p669_p8 = pnand %p668_p5, %p662_p13 }
  0x97   : > { %672 = shalt.err (!%p669_p8)
}
  0x98   : > { %503 = dma.vmem_to_hbm [thread:$0]  (%p1032_p11), %s965_s11, 128, %s972_s25, %s317_s26  }
  0x99 PF: > { %s376_s29 = sand.u32 1, %s703_s18   ;;  %p1033_p9 = scmp.ne.s32.totalorder %s1028_s6, 0 }
  0x9a   : > { %p1034_p0 = scmp.ge.s32.totalorder %s715_s21, 2  ;;  %s377_s13 = scalar_lea.sflag [#allocation4], %s376_s29 }
  0x9c   : > { %p514_p1 = pnand %p1034_p0, %p1033_p9 }
  0x9e   : > { %694 = dma.done.wait (!%p514_p1), %s377_s13, 128  }
  0x9f   : > { %696 = vsyncadd (!%p514_p1), %s377_s13, 4294967168  ;;  %s385_s12 = sand.u32 1, %s487_s23  }
  0xa0   : > { %s386_s9 = scalar_lea.sflag [#allocation7], %s385_s12 }
  0xa1   : > { %698 = dma.done.wait (!%p514_p1), %s386_s9, 32  }
  0xa2   : > { %700 = vsyncadd (!%p514_p1), %s386_s9, 4294967264  ;;  %p22_p11 = scmp.ge.s32.totalorder %s776_s24, 4   ;;  %s1035_s18 = smov %s707_s19 }
  0xa3   : > { %s1036_s19 = smov %s711_s20  ;;  %s1037_s20 = smov %s788_s27 }
  0xa4   : > { %s1038_s21 = smov %s776_s24  ;;  %24 = sbr.rel (!%p22_p11) target bundleno = 7 (0x7), region = 109 }
  0xab   :  { %398 = vsyncpa [#allocation3], 1 }
  0xac   :  { %400 = vsyncpa [#allocation3 + $0x1], 1 }
  0xad   :  { %401 = vsyncpa [#allocation4], 1 }
  0xae   :  { %403 = vsyncpa [#allocation4 + $0x1], 1 }
  0xaf   :  { %404 = vsyncpa [#allocation7], 1 }
  0xb0   :  { %406 = vsyncpa [#allocation7 + $0x1], 1 }

</bundles_post_ra>
